<compile_context>
chip_gen: v7x
topology: tpu7x:2x2x1
jax: 0.10.0
libtpu: 0.0.40
codegen_flags: <defaults>
</compile_context>

<pallas_src>
import functools

import jax
import jax.numpy as jnp
from jax.experimental import pallas as pl
from jax.experimental.pallas import tpu as pltpu


def _yolo_out_kernel(x_ref, grid_ref, anchors_ref, o_ref, *, stride, na, A):
    """Decode one (na*A, h*w) tile (all anchors of one batch element).

    Row layout (per anchor a, base = a*A):
      rows base+0 .. base+1 : (sigmoid(x) * stride) + grid_offset   (grid already *stride)
      rows base+2 .. base+3 : exp(x) * anchor_wh[a]
      rows base+4 .. base+A : sigmoid(x)
    """
    g = grid_ref[...]  # (2, h*w), float32, already stride-scaled

    for a in range(na):  # static, unrolled (na is small: typically 3)
        base = a * A

        xy = x_ref[0, base:base + 2, :].astype(jnp.float32)        # (2, hw)
        wh = x_ref[0, base + 2:base + 4, :].astype(jnp.float32)    # (2, hw)
        rest = x_ref[0, base + 4:base + A, :].astype(jnp.float32)  # (A-4, hw)

        awh = anchors_ref[a]  # (2, 1) static slice -> broadcast over lanes

        o_ref[0, base:base + 2, :] = (
            jax.nn.sigmoid(xy) * jnp.float32(stride) + g
        ).astype(o_ref.dtype)
        o_ref[0, base + 2:base + 4, :] = (jnp.exp(wh) * awh).astype(o_ref.dtype)
        o_ref[0, base + 4:base + A, :] = jax.nn.sigmoid(rest).astype(o_ref.dtype)


class YoloOutLayer:
    """JAX/Pallas port of the PyTorch YoloOutLayer (YOLOv3 head post-processing)."""

    def __init__(self, anchors, num_classes, img_size, training):
        self.num_anchors = len(anchors)
        self.num_classes = num_classes
        self.num_attr = num_classes + 5
        self.img_size = img_size
        self.training = training
        # register_buffer('anchors', ...) equivalent
        self.anchors = jnp.asarray(anchors, dtype=jnp.float32).reshape(-1, 2)

    def __call__(self, x):
        bs, _, h, w = x.shape
        na, A = self.num_anchors, self.num_attr
        stride = self.img_size // h

        if self.training:
            # training branch is a pure reshape/permute: no kernel needed
            return x.reshape(bs, na, A, h, w).transpose(0, 1, 3, 4, 2)

        hw = h * w
        # free reshape of NCHW: (bs, na*A, h, w) -> (bs, na*A, h*w); lane axis = h*w
        xk = x.reshape(bs, na * A, hw)

        # stride-scaled grid offsets, (2, hw): row0 = gx*stride, row1 = gy*stride
        yy, xx = jnp.meshgrid(jnp.arange(h, dtype=jnp.float32),
                              jnp.arange(w, dtype=jnp.float32), indexing="ij")
        grid_off = jnp.stack([xx.reshape(-1), yy.reshape(-1)], axis=0) * jnp.float32(stride)

        # per-anchor (w, h) as a (na, 2, 1) table for lane-broadcast multiplies
        anchor_wh = self.anchors.reshape(na, 2, 1)

        kernel = functools.partial(_yolo_out_kernel, stride=float(stride), na=na, A=A)

        out = pl.pallas_call(
            kernel,
            out_shape=jax.ShapeDtypeStruct((bs, na * A, hw), x.dtype),
            grid=(bs,),
            in_specs=[
                pl.BlockSpec((1, na * A, hw), lambda b: (b, 0, 0)),
                pl.BlockSpec((2, hw), lambda b: (0, 0)),          # resident constant
                pl.BlockSpec((na, 2, 1), lambda b: (0, 0, 0)),    # resident constant
            ],
            out_specs=pl.BlockSpec((1, na * A, hw), lambda b: (b, 0, 0)),
            compiler_params=pltpu.CompilerParams(
                dimension_semantics=("parallel",)),
        )(xk, grid_off, anchor_wh)

        # single XLA permutation to the PyTorch output order: (bs, na*h*w, A)
        return out.reshape(bs, na, A, h, w).transpose(0, 1, 3, 4, 2).reshape(bs, -1, A)


def _reference(x, anchors, num_classes, img_size):
    """Pure-JAX reference mirroring the PyTorch forward (inference mode)."""
    bs, _, h, w = x.shape
    na = anchors.shape[0]
    A = num_classes + 5
    stride = img_size // h
    xr = x.reshape(bs, na, A, h, w).transpose(0, 1, 3, 4, 2)
    yv, xv = jnp.meshgrid(jnp.arange(h), jnp.arange(w), indexing="ij")
    grid = jnp.stack((xv, yv), axis=2).reshape(1, 1, h, w, 2).astype(jnp.float32)
    xy = (jax.nn.sigmoid(xr[..., 0:2]) + grid) * stride
    wh = jnp.exp(xr[..., 2:4]) * anchors.reshape(1, na, 1, 1, 2)
    rest = jax.nn.sigmoid(xr[..., 4:])
    out = jnp.concatenate([xy, wh, rest], axis=-1)
    return out.reshape(bs, -1, A)


if __name__ == "__main__":
    bs = 2
    num_classes = 3                      # num_attr = 8
    img_size = 64
    h = w = 16                           # stride = 4
    anchors_list = [[10.0, 13.0], [16.0, 30.0], [33.0, 23.0]]
    na = len(anchors_list)
    A = num_classes + 5

    key = jax.random.PRNGKey(0)
    x = jax.random.normal(key, (bs, na * A, h, w), dtype=jnp.float32)

    layer = YoloOutLayer(anchors_list, num_classes, img_size, training=False)
    out = layer(x)
    out = jax.block_until_ready(out)

    ref = _reference(x, jnp.asarray(anchors_list, jnp.float32), num_classes, img_size)
    assert out.shape == (bs, na * h * w, A), out.shape
    assert jnp.allclose(out, ref, rtol=1e-5, atol=1e-4), float(
        jnp.max(jnp.abs(out - ref)))

    print("KERNEL_OK")
</pallas_src>

<mosaic_0001>
module attributes {stable_mosaic.version = 11 : i64} {
  func.func @_yolo_out_kernel(%arg0: i32, %arg1: memref<1x24x256xf32, #tpu.memory_space<vmem>>, %arg2: memref<2x256xf32, #tpu.memory_space<vmem>>, %arg3: memref<3x2x1xf32, #tpu.memory_space<vmem>>, %arg4: memref<1x24x256xf32, #tpu.memory_space<vmem>>) attributes {dimension_semantics = [#tpu.dimension_semantics<parallel>], iteration_bounds = array<i64: 2>, scalar_prefetch = 0 : i64, scratch_operands = 0 : i64, tpu.core_type = #tpu.core_type<tc>, window_params = [{transform_indices = @transform_0, window_bounds = array<i64: 1, 24, 256>}, {pipeline_mode = #tpu.pipeline_mode<synchronous>, transform_indices = @transform_1, window_bounds = array<i64: 2, 256>}, {pipeline_mode = #tpu.pipeline_mode<synchronous>, transform_indices = @transform_2, window_bounds = array<i64: 3, 2, 1>}, {transform_indices = @transform_3, window_bounds = array<i64: 1, 24, 256>}]} {
    %c0 = arith.constant 0 : index
    %c0_0 = arith.constant 0 : index
    %0 = vector.load %arg2[%c0, %c0_0] : memref<2x256xf32, #tpu.memory_space<vmem>>, vector<2x256xf32>
    %c0_1 = arith.constant 0 : index
    %c0_2 = arith.constant 0 : index
    %c0_3 = arith.constant 0 : index
    %1 = vector.load %arg1[%c0_1, %c0_2, %c0_3] : memref<1x24x256xf32, #tpu.memory_space<vmem>>, vector<1x2x256xf32>
    %2 = vector.shape_cast %1 : vector<1x2x256xf32> to vector<2x256xf32>
    %c0_4 = arith.constant 0 : index
    %c2 = arith.constant 2 : index
    %c0_5 = arith.constant 0 : index
    %3 = vector.load %arg1[%c0_4, %c2, %c0_5] : memref<1x24x256xf32, #tpu.memory_space<vmem>>, vector<1x2x256xf32>
    %4 = vector.shape_cast %3 : vector<1x2x256xf32> to vector<2x256xf32>
    %c0_6 = arith.constant 0 : index
    %c4 = arith.constant 4 : index
    %c0_7 = arith.constant 0 : index
    %5 = vector.load %arg1[%c0_6, %c4, %c0_7] : memref<1x24x256xf32, #tpu.memory_space<vmem>>, vector<1x4x256xf32>
    %6 = vector.shape_cast %5 : vector<1x4x256xf32> to vector<4x256xf32>
    %c0_8 = arith.constant 0 : index
    %c0_9 = arith.constant 0 : index
    %c0_10 = arith.constant 0 : index
    %7 = vector.load %arg3[%c0_8, %c0_9, %c0_10] : memref<3x2x1xf32, #tpu.memory_space<vmem>>, vector<1x2x1xf32>
    %8 = vector.shape_cast %7 : vector<1x2x1xf32> to vector<2x1xf32>
    %9 = arith.negf %2 : vector<2x256xf32>
    %10 = math.exp %9 : vector<2x256xf32>
    %cst = arith.constant 1.000000e+00 : f32
    %11 = vector.broadcast %cst : f32 to vector<2x256xf32>
    %12 = arith.addf %11, %10 : vector<2x256xf32>
    %13 = arith.divf %11, %12 : vector<2x256xf32>
    %cst_11 = arith.constant 4.000000e+00 : f32
    %14 = vector.broadcast %cst_11 : f32 to vector<2x256xf32>
    %15 = arith.mulf %13, %14 : vector<2x256xf32>
    %16 = arith.addf %15, %0 : vector<2x256xf32>
    %c0_12 = arith.constant 0 : index
    %c0_13 = arith.constant 0 : index
    %c0_14 = arith.constant 0 : index
    %17 = vector.load %arg4[%c0_12, %c0_13, %c0_14] : memref<1x24x256xf32, #tpu.memory_space<vmem>>, vector<1x2x256xf32>
    %18 = vector.shape_cast %17 : vector<1x2x256xf32> to vector<2x256xf32>
    %19 = vector.shape_cast %16 : vector<2x256xf32> to vector<1x2x256xf32>
    tpu.vector_store %arg4[%c0_12, %c0_13, %c0_14], %19 {strides = array<i32>} : memref<1x24x256xf32, #tpu.memory_space<vmem>>, vector<1x2x256xf32>,
    %20 = math.exp %4 : vector<2x256xf32>
    %21 = vector.broadcast %8 : vector<2x1xf32> to vector<2x256xf32>
    %22 = arith.mulf %20, %21 : vector<2x256xf32>
    %c0_15 = arith.constant 0 : index
    %c2_16 = arith.constant 2 : index
    %c0_17 = arith.constant 0 : index
    %23 = vector.load %arg4[%c0_15, %c2_16, %c0_17] : memref<1x24x256xf32, #tpu.memory_space<vmem>>, vector<1x2x256xf32>
    %24 = vector.shape_cast %23 : vector<1x2x256xf32> to vector<2x256xf32>
    %25 = vector.shape_cast %22 : vector<2x256xf32> to vector<1x2x256xf32>
    tpu.vector_store %arg4[%c0_15, %c2_16, %c0_17], %25 {strides = array<i32>} : memref<1x24x256xf32, #tpu.memory_space<vmem>>, vector<1x2x256xf32>,
    %26 = arith.negf %6 : vector<4x256xf32>
    %27 = math.exp %26 : vector<4x256xf32>
    %cst_18 = arith.constant 1.000000e+00 : f32
    %28 = vector.broadcast %cst_18 : f32 to vector<4x256xf32>
    %29 = arith.addf %28, %27 : vector<4x256xf32>
    %30 = arith.divf %28, %29 : vector<4x256xf32>
    %c0_19 = arith.constant 0 : index
    %c4_20 = arith.constant 4 : index
    %c0_21 = arith.constant 0 : index
    %31 = vector.load %arg4[%c0_19, %c4_20, %c0_21] : memref<1x24x256xf32, #tpu.memory_space<vmem>>, vector<1x4x256xf32>
    %32 = vector.shape_cast %31 : vector<1x4x256xf32> to vector<4x256xf32>
    %33 = vector.shape_cast %30 : vector<4x256xf32> to vector<1x4x256xf32>
    tpu.vector_store %arg4[%c0_19, %c4_20, %c0_21], %33 {strides = array<i32>} : memref<1x24x256xf32, #tpu.memory_space<vmem>>, vector<1x4x256xf32>,
    %c0_22 = arith.constant 0 : index
    %c8 = arith.constant 8 : index
    %c0_23 = arith.constant 0 : index
    %34 = vector.load %arg1[%c0_22, %c8, %c0_23] : memref<1x24x256xf32, #tpu.memory_space<vmem>>, vector<1x2x256xf32>
    %35 = vector.shape_cast %34 : vector<1x2x256xf32> to vector<2x256xf32>
    %c0_24 = arith.constant 0 : index
    %c10 = arith.constant 10 : index
    %c0_25 = arith.constant 0 : index
    %36 = vector.load %arg1[%c0_24, %c10, %c0_25] : memref<1x24x256xf32, #tpu.memory_space<vmem>>, vector<1x2x256xf32>
    %37 = vector.shape_cast %36 : vector<1x2x256xf32> to vector<2x256xf32>
    %c0_26 = arith.constant 0 : index
    %c12 = arith.constant 12 : index
    %c0_27 = arith.constant 0 : index
    %38 = vector.load %arg1[%c0_26, %c12, %c0_27] : memref<1x24x256xf32, #tpu.memory_space<vmem>>, vector<1x4x256xf32>
    %39 = vector.shape_cast %38 : vector<1x4x256xf32> to vector<4x256xf32>
    %c1 = arith.constant 1 : index
    %c0_28 = arith.constant 0 : index
    %c0_29 = arith.constant 0 : index
    %40 = vector.load %arg3[%c1, %c0_28, %c0_29] : memref<3x2x1xf32, #tpu.memory_space<vmem>>, vector<1x2x1xf32>
    %41 = vector.shape_cast %40 : vector<1x2x1xf32> to vector<2x1xf32>
    %42 = arith.negf %35 : vector<2x256xf32>
    %43 = math.exp %42 : vector<2x256xf32>
    %cst_30 = arith.constant 1.000000e+00 : f32
    %44 = vector.broadcast %cst_30 : f32 to vector<2x256xf32>
    %45 = arith.addf %44, %43 : vector<2x256xf32>
    %46 = arith.divf %44, %45 : vector<2x256xf32>
    %cst_31 = arith.constant 4.000000e+00 : f32
    %47 = vector.broadcast %cst_31 : f32 to vector<2x256xf32>
    %48 = arith.mulf %46, %47 : vector<2x256xf32>
    %49 = arith.addf %48, %0 : vector<2x256xf32>
    %c0_32 = arith.constant 0 : index
    %c8_33 = arith.constant 8 : index
    %c0_34 = arith.constant 0 : index
    %50 = vector.load %arg4[%c0_32, %c8_33, %c0_34] : memref<1x24x256xf32, #tpu.memory_space<vmem>>, vector<1x2x256xf32>
    %51 = vector.shape_cast %50 : vector<1x2x256xf32> to vector<2x256xf32>
    %52 = vector.shape_cast %49 : vector<2x256xf32> to vector<1x2x256xf32>
    tpu.vector_store %arg4[%c0_32, %c8_33, %c0_34], %52 {strides = array<i32>} : memref<1x24x256xf32, #tpu.memory_space<vmem>>, vector<1x2x256xf32>,
    %53 = math.exp %37 : vector<2x256xf32>
    %54 = vector.broadcast %41 : vector<2x1xf32> to vector<2x256xf32>
    %55 = arith.mulf %53, %54 : vector<2x256xf32>
    %c0_35 = arith.constant 0 : index
    %c10_36 = arith.constant 10 : index
    %c0_37 = arith.constant 0 : index
    %56 = vector.load %arg4[%c0_35, %c10_36, %c0_37] : memref<1x24x256xf32, #tpu.memory_space<vmem>>, vector<1x2x256xf32>
    %57 = vector.shape_cast %56 : vector<1x2x256xf32> to vector<2x256xf32>
    %58 = vector.shape_cast %55 : vector<2x256xf32> to vector<1x2x256xf32>
    tpu.vector_store %arg4[%c0_35, %c10_36, %c0_37], %58 {strides = array<i32>} : memref<1x24x256xf32, #tpu.memory_space<vmem>>, vector<1x2x256xf32>,
    %59 = arith.negf %39 : vector<4x256xf32>
    %60 = math.exp %59 : vector<4x256xf32>
    %cst_38 = arith.constant 1.000000e+00 : f32
    %61 = vector.broadcast %cst_38 : f32 to vector<4x256xf32>
    %62 = arith.addf %61, %60 : vector<4x256xf32>
    %63 = arith.divf %61, %62 : vector<4x256xf32>
    %c0_39 = arith.constant 0 : index
    %c12_40 = arith.constant 12 : index
    %c0_41 = arith.constant 0 : index
    %64 = vector.load %arg4[%c0_39, %c12_40, %c0_41] : memref<1x24x256xf32, #tpu.memory_space<vmem>>, vector<1x4x256xf32>
    %65 = vector.shape_cast %64 : vector<1x4x256xf32> to vector<4x256xf32>
    %66 = vector.shape_cast %63 : vector<4x256xf32> to vector<1x4x256xf32>
    tpu.vector_store %arg4[%c0_39, %c12_40, %c0_41], %66 {strides = array<i32>} : memref<1x24x256xf32, #tpu.memory_space<vmem>>, vector<1x4x256xf32>,
    %c0_42 = arith.constant 0 : index
    %c16 = arith.constant 16 : index
    %c0_43 = arith.constant 0 : index
    %67 = vector.load %arg1[%c0_42, %c16, %c0_43] : memref<1x24x256xf32, #tpu.memory_space<vmem>>, vector<1x2x256xf32>
    %68 = vector.shape_cast %67 : vector<1x2x256xf32> to vector<2x256xf32>
    %c0_44 = arith.constant 0 : index
    %c18 = arith.constant 18 : index
    %c0_45 = arith.constant 0 : index
    %69 = vector.load %arg1[%c0_44, %c18, %c0_45] : memref<1x24x256xf32, #tpu.memory_space<vmem>>, vector<1x2x256xf32>
    %70 = vector.shape_cast %69 : vector<1x2x256xf32> to vector<2x256xf32>
    %c0_46 = arith.constant 0 : index
    %c20 = arith.constant 20 : index
    %c0_47 = arith.constant 0 : index
    %71 = vector.load %arg1[%c0_46, %c20, %c0_47] : memref<1x24x256xf32, #tpu.memory_space<vmem>>, vector<1x4x256xf32>
    %72 = vector.shape_cast %71 : vector<1x4x256xf32> to vector<4x256xf32>
    %c2_48 = arith.constant 2 : index
    %c0_49 = arith.constant 0 : index
    %c0_50 = arith.constant 0 : index
    %73 = vector.load %arg3[%c2_48, %c0_49, %c0_50] : memref<3x2x1xf32, #tpu.memory_space<vmem>>, vector<1x2x1xf32>
    %74 = vector.shape_cast %73 : vector<1x2x1xf32> to vector<2x1xf32>
    %75 = arith.negf %68 : vector<2x256xf32>
    %76 = math.exp %75 : vector<2x256xf32>
    %cst_51 = arith.constant 1.000000e+00 : f32
    %77 = vector.broadcast %cst_51 : f32 to vector<2x256xf32>
    %78 = arith.addf %77, %76 : vector<2x256xf32>
    %79 = arith.divf %77, %78 : vector<2x256xf32>
    %cst_52 = arith.constant 4.000000e+00 : f32
    %80 = vector.broadcast %cst_52 : f32 to vector<2x256xf32>
    %81 = arith.mulf %79, %80 : vector<2x256xf32>
    %82 = arith.addf %81, %0 : vector<2x256xf32>
    %c0_53 = arith.constant 0 : index
    %c16_54 = arith.constant 16 : index
    %c0_55 = arith.constant 0 : index
    %83 = vector.load %arg4[%c0_53, %c16_54, %c0_55] : memref<1x24x256xf32, #tpu.memory_space<vmem>>, vector<1x2x256xf32>
    %84 = vector.shape_cast %83 : vector<1x2x256xf32> to vector<2x256xf32>
    %85 = vector.shape_cast %82 : vector<2x256xf32> to vector<1x2x256xf32>
    tpu.vector_store %arg4[%c0_53, %c16_54, %c0_55], %85 {strides = array<i32>} : memref<1x24x256xf32, #tpu.memory_space<vmem>>, vector<1x2x256xf32>,
    %86 = math.exp %70 : vector<2x256xf32>
    %87 = vector.broadcast %74 : vector<2x1xf32> to vector<2x256xf32>
    %88 = arith.mulf %86, %87 : vector<2x256xf32>
    %c0_56 = arith.constant 0 : index
    %c18_57 = arith.constant 18 : index
    %c0_58 = arith.constant 0 : index
    %89 = vector.load %arg4[%c0_56, %c18_57, %c0_58] : memref<1x24x256xf32, #tpu.memory_space<vmem>>, vector<1x2x256xf32>
    %90 = vector.shape_cast %89 : vector<1x2x256xf32> to vector<2x256xf32>
    %91 = vector.shape_cast %88 : vector<2x256xf32> to vector<1x2x256xf32>
    tpu.vector_store %arg4[%c0_56, %c18_57, %c0_58], %91 {strides = array<i32>} : memref<1x24x256xf32, #tpu.memory_space<vmem>>, vector<1x2x256xf32>,
    %92 = arith.negf %72 : vector<4x256xf32>
    %93 = math.exp %92 : vector<4x256xf32>
    %cst_59 = arith.constant 1.000000e+00 : f32
    %94 = vector.broadcast %cst_59 : f32 to vector<4x256xf32>
    %95 = arith.addf %94, %93 : vector<4x256xf32>
    %96 = arith.divf %94, %95 : vector<4x256xf32>
    %c0_60 = arith.constant 0 : index
    %c20_61 = arith.constant 20 : index
    %c0_62 = arith.constant 0 : index
    %97 = vector.load %arg4[%c0_60, %c20_61, %c0_62] : memref<1x24x256xf32, #tpu.memory_space<vmem>>, vector<1x4x256xf32>
    %98 = vector.shape_cast %97 : vector<1x4x256xf32> to vector<4x256xf32>
    %99 = vector.shape_cast %96 : vector<4x256xf32> to vector<1x4x256xf32>
    tpu.vector_store %arg4[%c0_60, %c20_61, %c0_62], %99 {strides = array<i32>} : memref<1x24x256xf32, #tpu.memory_space<vmem>>, vector<1x4x256xf32>,
    return
  }
  func.func @transform_0(%arg0: i32) -> (i32, i32, i32) {
    %c0_i32 = arith.constant 0 : i32
    %c0_i32_0 = arith.constant 0 : i32
    %c0_i32_1 = arith.constant 0 : i32
    return %arg0, %c0_i32, %c0_i32_0 : i32, i32, i32
  }
  func.func @transform_1(%arg0: i32) -> (i32, i32) {
    %c0_i32 = arith.constant 0 : i32
    %c0_i32_0 = arith.constant 0 : i32
    %c0_i32_1 = arith.constant 0 : i32
    return %c0_i32, %c0_i32_0 : i32, i32
  }
  func.func @transform_2(%arg0: i32) -> (i32, i32, i32) {
    %c0_i32 = arith.constant 0 : i32
    %c0_i32_0 = arith.constant 0 : i32
    %c0_i32_1 = arith.constant 0 : i32
    %c0_i32_2 = arith.constant 0 : i32
    return %c0_i32, %c0_i32_0, %c0_i32_1 : i32, i32, i32
  }
  func.func @transform_3(%arg0: i32) -> (i32, i32, i32) {
    %c0_i32 = arith.constant 0 : i32
    %c0_i32_0 = arith.constant 0 : i32
    %c0_i32_1 = arith.constant 0 : i32
    return %arg0, %c0_i32, %c0_i32_0 : i32, i32, i32
  }
}

</mosaic_0001>

<bundles_post_ra>
// kernel: tpu_custom_call.1
= control target key start
LH: loop header
LB: loop body
LE: loop exit
PB: predicated region body
PF: predicated region fallthrough
CT: control target
= control target key end

     0   :  { %8 = vsyncpa [#allocation3], 0  ;;  %s927_s0 = inlined_call_operand.hbm [shape: f32[2,24,256], index: 0, kind: input, shape index: {}]   ;;  %s928_s1 = inlined_call_operand.vmem [shape: f32[2,256], index: 1, kind: input, shape index: {}]   ;;  %s929_s2 = inlined_call_operand.vmem [shape: f32[3,2,1], index: 2, kind: input, shape index: {}]   ;;  %s930_s3 = inlined_call_operand.hbm [shape: f32[2,24,256], index: 3, kind: output, shape index: {}]  }
   0x1   :  { %10 = vsyncpa [#allocation3 + $0x1], 0 }
   0x2   :  { %11 = vsyncpa [#allocation4], 0 }
   0x3   :  { %13 = vsyncpa [#allocation4 + $0x1], 0  ;;  %s714_s12 = smov 0   ;;  %s716_s13 = smov 0  }
   0x4   :  { %s718_s14 = smov 0   ;;  %s720_s15 = smov 0  }
   0x5 LB: > { %s735_s16 = sadd.s32 4294967295, %s685_s15   ;;  %s449_s17 = sadd.s32 4294967294, %s685_s15   ;;  %s685_s15 = sphi %s720_s15, %s942_s15   ;;  %s681_s14 = sphi %s718_s14, %s941_s14   ;;  %s677_s13 = sphi %s716_s13, %s940_s13   ;;  %s673_s12 = sphi %s714_s12, %s939_s12  }
   0x6   : > { %s739_s18 = sadd.s32 1, %s685_s15   ;;  %s26_s19 = sadd.s32 1, %s681_s14 }
   0x7   : > { %s23_s20 = ssub.s32 %s685_s15, %s739_s18  ;;  %p33_p0 = scmp.ne.s32.totalorder %s681_s14, %s677_s13 }
   0x8   : > { %p24_p1 = scmp.eq.s32.totalorder %s23_s20, 0  ;;  %p34_p2 = scmp.eq.s32.totalorder %s685_s15, 0 }
   0x9   : > { %p39_p3 = scmp.ne.s32.totalorder %s677_s13, %s673_s12  ;;  %p40_p4 = scmp.eq.s32.totalorder %s735_s16, 0 }
   0xa   : > { %s751_s21 = scalar_select %p24_p1, %s681_s14, %s26_s19  }
   0xb   : > { %p35_p5 = por %p34_p2, %p33_p0  ;;  %p753_p6 = por %p40_p4, %p39_p3 }
   0xc   : > { %p105_p7 = scmp.eq.s32.totalorder %s735_s16, 1  ;;  %p111_p8 = scmp.eq.s32.totalorder %s449_s17, 1 }
   0xd   : > { %p488_p10 = scmp.lt.s32.totalorder %s685_s15, 2  ;;  %s137_s25 = sand.u32 1, %s681_s14  }
   0xe   : > { %p760_p11 = por %p105_p7, %p33_p0  ;;  %p764_p12 = por %p111_p8, %p39_p3 }
   0xf   : > { %s473_s26 = smul.u32 768, %s685_s15  ;;  %p775_p13 = pnand %p488_p10, %p35_p5 }
  0x10   : > { %s933_s23 = scalar_select %p760_p11, 1, 0 }
  0x11   : > { %s934_s24 = scalar_select %p764_p12, 1, 0 }
  0x12   : > { %s472_s27 = smul.u32 48, %s137_s25  ;;  %s773_s30 = scalar_lea.hbm %s927_s0, %s473_s26 }
  0x13   : > { %s781_s7 = scalar_lea.sflag [#allocation3], %s137_s25  ;;  %s589_s8 = scalar_lea.hbm %s773_s30, 768 }
  0x14   : > { %s141_s5 = scalar_lea.vmem [#allocation2], %s472_s27  ;;  %p590_p0 = scmp.ne.s32.totalorder %s773_s30, %s589_s8 }
  0x15   : > { %s148_s6 = sshll.u32 %s141_s5, 4  ;;  %p591_p1 = pneg %p775_p13  ;;  %s779_s6 = int_to_ptr.vmem [resolvable:$true] %s148_s6 }
  0x16   : > { %s594_s11 = scalar_lea.hbm %s927_s0, 1536  ;;  %p595_p4 = scmp.lt.u32.totalorder %s773_s30, %s927_s0 }
  0x17   : > { %p592_p2 = pnand %p591_p1, %p590_p0  ;;  %p596_p5 = scmp.lt.u32.totalorder %s594_s11, %s589_s8 }
  0x18   : > { %p598_p8 = scmp.lt.u32.totalorder %s589_s8, %s773_s30 }
  0x19   : > { %p593_p3 = pneg %p592_p2  ;;  %p597_p7 = por %p596_p5, %p595_p4 }
  0x1b   : > { %p599_p10 = por %p598_p8, %p597_p7 }
  0x1d   : > { %p600_p9 = pnand %p599_p10, %p593_p3 }
  0x1f   : > { %603 = shalt.err (!%p600_p9)
}
  0x20   : > { %s604_s20 = scalar_lea.vmem %s779_s6, 768  ;;  %s687_s25 = smov [#allocation2]  }
  0x21   : > { %p605_p0 = scmp.ne.s32.totalorder %s779_s6, %s604_s20  ;;  %s609_s26 = sshll.u32 %s687_s25, 4  ;;  %s610_s26 = int_to_ptr.vmem [resolvable:$false] %s609_s26 }
  0x22   : > { %s611_s27 = scalar_lea.vmem %s610_s26, 1536  ;;  %p612_p11 = scmp.lt.s32.totalorder %s779_s6, %s610_s26 }
  0x23   : > { %p607_p2 = pnand %p605_p0, %p591_p1  ;;  %p613_p4 = scmp.lt.s32.totalorder %s611_s27, %s604_s20 }
  0x25   : > { %p608_p12 = pneg %p607_p2  ;;  %p614_p5 = por %p613_p4, %p612_p11 }
  0x27   : > { %p615_p7 = pnand %p614_p5, %p608_p12 }
  0x29   : > { %618 = shalt.err (!%p615_p7)
}
  0x2a   : > { %s688_s28 = smov 256   ;;  %s689_s29 = smov 16  }
  0x2b   : > { %483 = dma.hbm_to_vmem [thread:$0]  (!%p775_p13), %s773_s30, 768, %s779_s6, %s781_s7, %s688_s28, %s688_s28, %s689_s29  }
  0x2c   : > { %p453_p9 = scmp.ge.s32.totalorder %s685_s15, 1  ;;  %p156_p1 = scmp.lt.s32.totalorder %s685_s15, 3 }
  0x2e   : > { %p157_p3 = pnand %p453_p9, %p156_p1 }
  0x2f   : > { %s812_s5 = sand.u32 (!%p157_p3), 1, %s677_s13  }
  0x30   : > { %160 = sbr.rel (%p157_p3) target bundleno = 209 (0xd1), region = 32  ;;  %s163_s9 = scalar_lea.sflag (!%p157_p3), [#allocation3], %s812_s5 }
  0x31   : > { %s474_s8 = smul.u32 (!%p157_p3), 48, %s812_s5 }
  0x33   : > { %s818_s10 = scalar_lea.vmem (!%p157_p3), [#allocation2], %s474_s8 }
  0x37   : > { %664 = dma.done.wait (%p753_p6), %s163_s9, 768  }
  0x38   : > { %666 = vsyncadd (%p753_p6), %s163_s9, 4294966528  ;;  %v690_v0 = vmov 0   ;;  %v196_v1 = vld [vmem:[%s929_s2] sm:$0x3]  ;;  %v464_v2 = vld [vmem:[%s929_s2 + $0x4] sm:$0x3] }
  0x39   : > { %527 = vset.pattern.permute.xlu0 %v690_v0  ;;  %528 = vset.pattern.permute.xlu1 %v690_v0  ;;  %v459_v3 = vld [vmem:[%s929_s2 + $0x2] sm:$0x3]  ;;  %v190_v4 = vld [vmem:[%s818_s10] sm:$0x3]  ;;  %v191_v5 = vld [vmem:[%s818_s10 + $0x8] sm:$0x3] }
  0x3a   : > { %232 = vperm.xlu0 %527, %v196_v1   ;;  %340 = vperm.xlu1 %528, %v464_v2   ;;  %v194_v6 = vld [vmem:[%s818_s10] sm:$0xf0]  ;;  %v195_v7 = vld [vmem:[%s818_s10 + $0x8] sm:$0xf0]  ;;  %v454_v8 = vmul.f32 -1.442695, %v190_v4 }
  0x3b   : > { %v455_v9 = vmul.f32 -1.442695, %v191_v5  ;;  %v457_v10 = vmul.f32 -1.442695, %v194_v6  ;;  %v254_v11 = vld [vmem:[%s818_s10 + $0x10] sm:$0x3] }
  0x3c   : > { %v255_v12 = vld [vmem:[%s818_s10 + $0x18] sm:$0x3]  ;;  %v458_v13 = vmul.f32 -1.442695, %v195_v7  ;;  %v258_v14 = vld [vmem:[%s818_s10 + $0x10] sm:$0xf0]  ;;  %529 = vpow2.f32 %v454_v8 }
  0x3d   : > { %v259_v15 = vld [vmem:[%s818_s10 + $0x18] sm:$0xf0]  ;;  %v460_v16 = vmul.f32 -1.442695, %v254_v11  ;;  %531 = vpow2.f32 %v455_v9  ;;  %v461_v17 = vmul.f32 -1.442695, %v255_v12 }
  0x3e   : > { %286 = vperm.xlu0 %527, %v459_v3   ;;  %v308_v18 = vld [vmem:[%s818_s10 + $0x20] sm:$0x3]  ;;  %533 = vpow2.f32 %v457_v10  ;;  %v462_v19 = vmul.f32 -1.442695, %v258_v14  ;;  %v309_v20 = vld [vmem:[%s818_s10 + $0x28] sm:$0x3] }
  0x3f   : > { %535 = vpow2.f32 %v458_v13  ;;  %v463_v21 = vmul.f32 -1.442695, %v259_v15  ;;  %v312_v22 = vld [vmem:[%s818_s10 + $0x20] sm:$0xf0]  ;;  %v313_v23 = vld [vmem:[%s818_s10 + $0x28] sm:$0xf0] }
  0x40   : > { %537 = vpow2.f32 %v460_v16  ;;  %v465_v24 = vmul.f32 -1.442695, %v308_v18  ;;  %v466_v25 = vmul.f32 -1.442695, %v309_v20  ;;  %v467_v26 = vmul.f32 -1.442695, %v312_v22 }
  0x41   : > { %539 = vpow2.f32 %v461_v17  ;;  %v468_v27 = vmul.f32 -1.442695, %v313_v23  ;;  %v456_v48 = vld.sshfl [vmem:[%s928_s1] sm:$0x33 pattern:$0x76325410] }
  0x42   : > { %541 = vpow2.f32 %v462_v19  ;;  %v219_v54 = vcombine.high %v456_v48, %v456_v48  ;;  %s850_s20 = scalar_lea.vmem [#allocation5], %s474_s8  ;;  %v192_v14 = vld [vmem:[%s818_s10] sm:$0xc]  ;;  %v193_v15 = vld [vmem:[%s818_s10 + $0x8] sm:$0xc]  ;;  %s475_s25 = smul.u32 768, %s735_s16 }
  0x43   : > { %543 = vpow2.f32 %v463_v21  ;;  %v310_v16 = vld [vmem:[%s818_s10 + $0x20] sm:$0xc]  ;;  %v226_v17 = vmul.f32 1.442695, %v192_v14  ;;  %v311_v18 = vld [vmem:[%s818_s10 + $0x28] sm:$0xc] }
  0x44   : > { %545 = vpow2.f32 %v465_v24  ;;  %v228_v19 = vmul.f32 1.442695, %v193_v15  ;;  %v334_v20 = vmul.f32 1.442695, %v310_v16  ;;  %v336_v21 = vmul.f32 1.442695, %v311_v18  ;;  %s879_s16 = scalar_lea.hbm %s930_s3, %s475_s25 }
  0x45   : > { %547 = vpow2.f32 %v466_v25  ;;  %v256_v22 = vld [vmem:[%s818_s10 + $0x10] sm:$0xc]  ;;  %v257_v23 = vld [vmem:[%s818_s10 + $0x18] sm:$0xc]  ;;  %s376_s26 = sshll.u32 %s850_s20, 4  ;;  %s363_s29 = scalar_lea.sflag [#allocation4], %s812_s5  ;;  %s881_s26 = int_to_ptr.vmem [resolvable:$true] %s376_s26 }
  0x46   : > { %v530_v28 = vpop.eup %529  ;;  %549 = vpow2.f32 %v467_v26  ;;  %v280_v24 = vmul.f32 1.442695, %v256_v22  ;;  %v282_v25 = vmul.f32 1.442695, %v257_v23  ;;  %s619_s8 = scalar_lea.vmem %s881_s26, 768  ;;  %p936_p11 = scmp.ne.s32.totalorder %s933_s23, 0 }
  0x47   : > { %v532_v29 = vpop.eup %531  ;;  %v203_v30 = vadd.f32 1.0, %v530_v28  ;;  %551 = vpow2.f32 %v468_v27  ;;  %p620_p6 = scmp.ne.s32.totalorder %s881_s26, %s619_s8  ;;  %s691_s9 = smov [#allocation5]  }
  0x48   : > { %v534_v31 = vpop.eup %533  ;;  %v204_v32 = vadd.f32 1.0, %v532_v29  ;;  %s623_s10 = sshll.u32 %s691_s9, 4  ;;  %s624_s10 = int_to_ptr.vmem [resolvable:$false] %s623_s10 }
  0x49   : > { %v536_v33 = vpop.eup %535  ;;  %553 = vrcp.f32 %v203_v30  ;;  %v246_v34 = vadd.f32 1.0, %v534_v31  ;;  %p621_p12 = pnand %p620_p6, %p936_p11  ;;  %s625_s30 = scalar_lea.vmem %s624_s10, 1536 }
  0x4a   : > { %v538_v35 = vpop.eup %537  ;;  %555 = vrcp.f32 %v204_v32  ;;  %v247_v36 = vadd.f32 1.0, %v536_v33  ;;  %p626_p8 = scmp.lt.s32.totalorder %s881_s26, %s624_s10  ;;  %p627_p10 = scmp.lt.s32.totalorder %s625_s30, %s619_s8 }
  0x4b   : > { %v540_v37 = vpop.eup %539  ;;  %557 = vrcp.f32 %v246_v34  ;;  %v268_v38 = vadd.f32 1.0, %v538_v35  ;;  %p622_p13 = pneg %p621_p12 }
  0x4c   : > { %v542_v39 = vpop.eup %541  ;;  %559 = vrcp.f32 %v247_v36  ;;  %v269_v40 = vadd.f32 1.0, %v540_v37  ;;  %p628_p0 = por %p627_p10, %p626_p8 }
  0x4d   : > { %v544_v41 = vpop.eup %543  ;;  %561 = vrcp.f32 %v268_v38  ;;  %v300_v42 = vadd.f32 1.0, %v542_v39 }
  0x4e   : > { %v546_v43 = vpop.eup %545  ;;  %563 = vrcp.f32 %v269_v40  ;;  %v301_v44 = vadd.f32 1.0, %v544_v41  ;;  %p629_p2 = pnand %p628_p0, %p622_p13 }
  0x4f   : > { %v548_v45 = vpop.eup %547  ;;  %565 = vrcp.f32 %v300_v42  ;;  %v322_v46 = vadd.f32 1.0, %v546_v43 }
  0x50   : > { %v550_v47 = vpop.eup %549  ;;  %567 = vrcp.f32 %v301_v44  ;;  %v323_v49 = vadd.f32 1.0, %v548_v45 }
  0x51   : > { %v552_v50 = vpop.eup %551  ;;  %569 = vrcp.f32 %v322_v46  ;;  %v354_v51 = vadd.f32 1.0, %v550_v47 }
  0x52   : > { %571 = vrcp.f32 %v323_v49  ;;  %v355_v52 = vadd.f32 1.0, %v552_v50 }
  0x53   : > { %v554_v53 = vpop.eup %553  ;;  %573 = vrcp.f32 %v354_v51 }
  0x54   : > { %v556_v55 = vpop.eup %555  ;;  %v209_v56 = vmul.f32 4.0, %v554_v53  ;;  %575 = vrcp.f32 %v355_v52 }
  0x55   : > { %v558_v57 = vpop.eup %557  ;;  %v210_v58 = vmul.f32 4.0, %v556_v55  ;;  %577 = vpow2.f32 %v226_v17 }
  0x56   : > { %v560_v59 = vpop.eup %559  ;;  %v222_v60 = vadd.f32 %v456_v48, %v209_v56  ;;  %252 = vst [vmem:[%s850_s20] sm:$0xf0] %v558_v57  ;;  %579 = vpow2.f32 %v228_v19 }
  0x57   : > { %v562_v61 = vpop.eup %561  ;;  %v223_v62 = vadd.f32 %v219_v54, %v210_v58  ;;  %253 = vst [vmem:[%s850_s20 + $0x8] sm:$0xf0] %v560_v59  ;;  %581 = vpow2.f32 %v334_v20 }
  0x58   : > { %v564_v63 = vpop.eup %563  ;;  %224 = vst [vmem:[%s850_s20] sm:$0x3] %v222_v60  ;;  %v274_v0 = vmul.f32 4.0, %v562_v61  ;;  %583 = vpow2.f32 %v336_v21 }
  0x59   : > { %v566_v1 = vpop.eup %565  ;;  %225 = vst [vmem:[%s850_s20 + $0x8] sm:$0x3] %v223_v62  ;;  %v275_v2 = vmul.f32 4.0, %v564_v63  ;;  %585 = vpow2.f32 %v280_v24 }
  0x5a   : > { %v568_v3 = vpop.eup %567  ;;  %v276_v4 = vadd.f32 %v456_v48, %v274_v0  ;;  %306 = vst [vmem:[%s850_s20 + $0x10] sm:$0xf0] %v566_v1  ;;  %587 = vpow2.f32 %v282_v25 }
  0x5b   : > { %v570_v5 = vpop.eup %569  ;;  %v277_v6 = vadd.f32 %v275_v2, %v219_v54  ;;  %307 = vst [vmem:[%s850_s20 + $0x18] sm:$0xf0] %v568_v3 }
  0x5c   : > { %v572_v7 = vpop.eup %571  ;;  %278 = vst [vmem:[%s850_s20 + $0x10] sm:$0x3] %v276_v4  ;;  %v328_v8 = vmul.f32 4.0, %v570_v5 }
  0x5d   : > { %v574_v9 = vpop.eup %573  ;;  %279 = vst [vmem:[%s850_s20 + $0x18] sm:$0x3] %v277_v6  ;;  %v329_v10 = vmul.f32 4.0, %v572_v7 }
  0x5e   : > { %v576_v11 = vpop.eup %575  ;;  %v330_v12 = vadd.f32 %v456_v48, %v328_v8  ;;  %360 = vst [vmem:[%s850_s20 + $0x20] sm:$0xf0] %v574_v9 }
  0x5f   : > { %v331_v13 = vadd.f32 %v329_v10, %v219_v54  ;;  %361 = vst [vmem:[%s850_s20 + $0x28] sm:$0xf0] %v576_v11  ;;  %v578_v26 = vpop.eup %577 }
  0x60   : > { %332 = vst [vmem:[%s850_s20 + $0x20] sm:$0x3] %v330_v12  ;;  %v580_v27 = vpop.eup %579 }
  0x61   : > { %333 = vst [vmem:[%s850_s20 + $0x28] sm:$0x3] %v331_v13  ;;  %v582_v28 = vpop.eup %581 }
  0x62   : > { %v584_v29 = vpop.eup %583 }
  0x63   : > { %v586_v34 = vpop.eup %585 }
  0x64   : > { %v588_v39 = vpop.eup %587 }
  0xb9   : > { %v233_v30 = vpop.permute.xlu0 %232  ;;  %v341_v31 = vpop.permute.xlu1 %340 }
  0xba   : > { %v234_v32 = vrot.slane %v233_v30, 6  ;;  %v342_v33 = vrot.slane %v341_v31, 6 }
  0xbc   : > { %v236_v35 = vmul.f32 %v578_v26, %v234_v32  ;;  %v237_v36 = vmul.f32 %v580_v27, %v234_v32  ;;  %v344_v37 = vmul.f32 %v582_v28, %v342_v33  ;;  %v345_v38 = vmul.f32 %v584_v29, %v342_v33 }
  0xbd   : > { %v287_v40 = vpop.permute.xlu0 %286 }
  0xbe   : > { %238 = vst [vmem:[%s850_s20] sm:$0xc] %v236_v35  ;;  %239 = vst [vmem:[%s850_s20 + $0x8] sm:$0xc] %v237_v36  ;;  %v288_v41 = vrot.slane %v287_v40, 6 }
  0xbf   : > { %346 = vst [vmem:[%s850_s20 + $0x20] sm:$0xc] %v344_v37  ;;  %347 = vst [vmem:[%s850_s20 + $0x28] sm:$0xc] %v345_v38 }
  0xc0   : > { %v290_v42 = vmul.f32 %v586_v34, %v288_v41  ;;  %v291_v43 = vmul.f32 %v588_v39, %v288_v41 }
  0xc2   : > { %292 = vst [vmem:[%s850_s20 + $0x10] sm:$0xc] %v290_v42  ;;  %293 = vst [vmem:[%s850_s20 + $0x18] sm:$0xc] %v291_v43 }
  0xc3   : > { %632 = shalt.err (!%p629_p2)
}
  0xc4   : > { %s633_s4 = scalar_lea.hbm %s879_s16, 768  ;;  %s637_s22 = scalar_lea.hbm %s930_s3, 1536 }
  0xc5   : > { %p634_p4 = scmp.ne.s32.totalorder %s879_s16, %s633_s4  ;;  %p638_p9 = scmp.lt.u32.totalorder %s879_s16, %s930_s3 }
  0xc6   : > { %p639_p1 = scmp.lt.u32.totalorder %s637_s22, %s633_s4  ;;  %p641_p6 = scmp.lt.u32.totalorder %s633_s4, %s879_s16 }
  0xc7   : > { %p635_p5 = pnand %p634_p4, %p936_p11 }
  0xc8   : > { %p640_p3 = por %p639_p1, %p638_p9 }
  0xc9   : > { %p636_p7 = pneg %p635_p5 }
  0xca   : > { %p642_p12 = por %p641_p6, %p640_p3 }
  0xcc   : > { %p643_p13 = pnand %p642_p12, %p636_p7 }
  0xce   : > { %646 = shalt.err (!%p643_p13)
}
  0xcf   : > { %s692_s19 = smov 256   ;;  %s693_s20 = smov 16  }
  0xd0   : > { %478 = dma.vmem_to_hbm [thread:$0]  (%p936_p11), %s881_s26, 768, %s879_s16, %s363_s29, %s692_s19, %s692_s19, %s693_s20  }
  0xd1 PF: > { %s391_s25 = sand.u32 1, %s673_s12   ;;  %p937_p8 = scmp.ne.s32.totalorder %s934_s24, 0 }
  0xd2   : > { %p938_p10 = scmp.ge.s32.totalorder %s685_s15, 2  ;;  %s392_s27 = scalar_lea.sflag [#allocation4], %s391_s25 }
  0xd4   : > { %p485_p0 = pnand %p938_p10, %p937_p8 }
  0xd6   : > { %668 = dma.done.wait (!%p485_p0), %s392_s27, 768  }
  0xd7   : > { %670 = vsyncadd (!%p485_p0), %s392_s27, 4294966528  ;;  %p16_p2 = scmp.ge.s32.totalorder %s739_s18, 4   ;;  %s939_s12 = smov %s677_s13 }
  0xd8   : > { %s940_s13 = smov %s681_s14  ;;  %s941_s14 = smov %s751_s21 }
  0xd9   : > { %s942_s15 = smov %s739_s18  ;;  %18 = sbr.rel (!%p16_p2) target bundleno = 5 (0x5), region = 79 }
  0xe0   :  { %397 = vsyncpa [#allocation3], 1 }
  0xe1   :  { %399 = vsyncpa [#allocation3 + $0x1], 1 }
  0xe2   :  { %400 = vsyncpa [#allocation4], 1 }
  0xe3   :  { %402 = vsyncpa [#allocation4 + $0x1], 1 }

</bundles_post_ra>
